<compile_context>
chip_gen: v7x
topology: tpu7x:2x2x1
jax: 0.10.0
libtpu: 0.0.40
codegen_flags: <defaults>
</compile_context>

<pallas_src>
import functools

import jax
import jax.numpy as jnp
from jax.experimental import pallas as pl
from jax.experimental.pallas import tpu as pltpu


def _round_up(x, m):
    return (x + m - 1) // m * m


# ---------------------------------------------------------------------------
# Pallas kernel: K-tiled bf16 GEMM with f32 accumulator, fused
# per-output-channel scale/shift + optional ReLU epilogue.
# ---------------------------------------------------------------------------
def _conv_gemm_kernel(x_ref, w_ref, scale_ref, shift_ref, o_ref, acc_ref, *,
                      relu):
    k = pl.program_id(2)

    @pl.when(k == 0)
    def _():
        acc_ref[...] = jnp.zeros_like(acc_ref)

    acc_ref[...] += jnp.dot(x_ref[...], w_ref[...],
                            preferred_element_type=jnp.float32)

    @pl.when(k == pl.num_programs(2) - 1)
    def _():
        y = acc_ref[...] * scale_ref[...] + shift_ref[...]
        if relu:
            y = jnp.maximum(y, 0.0)
        o_ref[...] = y.astype(o_ref.dtype)


def _fused_conv_gemm(x_col, w_mat, scale, shift, *, relu):
    """x_col: (M, K) bf16, w_mat: (K, OCp) bf16 with OCp % 128 == 0,
    scale/shift: (1, OCp) f32.  Returns (M, OCp) f32."""
    M, K = x_col.shape
    Kw, OCp = w_mat.shape
    assert K == Kw and OCp % 128 == 0

    # ---- K (contraction) tiling -------------------------------------------
    # Small/medium K: a single reduction step with full-dim blocks (legal per
    # the "block dim == full array dim" exemption), so no K padding of the
    # big patch matrix.  Large K: pad to a 128-multiple and tile.
    if K <= 2048:
        tk, Kp = K, K
    else:
        Kp = _round_up(K, 128)
        tk = next(c for c in (512, 384, 256, 128) if Kp % c == 0)
    if Kp != K:
        x_col = jnp.pad(x_col, ((0, 0), (0, Kp - K)))
        w_mat = jnp.pad(w_mat, ((0, Kp - K), (0, 0)))

    # ---- OC tiling: lane-dense output (256 feeds the 256x256 MXU on
    # v6e/v7x; 128 keeps v5e's 128x128 MXU full). ---------------------------
    tn = 256 if OCp % 256 == 0 else 128

    # ---- M tiling: 512 on v6e/v7x-sized problems (sweep 256/512/1024);
    # small M just rounds up to the bf16 sublane packing (16). --------------
    if M >= 512:
        tm = next((c for c in (512, 256, 128) if M % c == 0), 512)
    else:
        tm = _round_up(M, 16)
    Mp = _round_up(M, tm)
    if Mp != M:
        # < tm zero rows; fuses with the patch producer under jit (the padded
        # rows only produce garbage in rows that are sliced off below).
        x_col = jnp.pad(x_col, ((0, Mp - M), (0, 0)))

    grid = (Mp // tm, OCp // tn, Kp // tk)

    cost = pl.CostEstimate(
        flops=2 * Mp * Kp * OCp,
        transcendentals=0,
        bytes_accessed=(Mp * Kp * 2 + Kp * OCp * 2 + 2 * OCp * 4
                        + Mp * OCp * 4),
    )

    out = pl.pallas_call(
        functools.partial(_conv_gemm_kernel, relu=relu),
        out_shape=jax.ShapeDtypeStruct((Mp, OCp), jnp.float32),
        grid_spec=pltpu.PrefetchScalarGridSpec(
            num_scalar_prefetch=0,
            grid=grid,
            in_specs=[
                pl.BlockSpec((tm, tk), lambda i, j, k: (i, k)),
                pl.BlockSpec((tk, tn), lambda i, j, k: (k, j)),
                pl.BlockSpec((1, tn), lambda i, j, k: (0, j)),
                pl.BlockSpec((1, tn), lambda i, j, k: (0, j)),
            ],
            out_specs=pl.BlockSpec((tm, tn), lambda i, j, k: (i, j)),
            scratch_shapes=[pltpu.VMEM((tm, tn), jnp.float32)],
        ),
        compiler_params=pltpu.CompilerParams(
            # M / OC parallel (megacore on v6e, 2 TCs on v7x); K reduction
            # last and "arbitrary" so the accumulator is valid.
            dimension_semantics=("parallel", "parallel", "arbitrary"),
            vmem_limit_bytes=32 * 1024 * 1024,
        ),
        cost_estimate=cost,
    )(x_col, w_mat, scale, shift)
    return out[:M]


# ---------------------------------------------------------------------------
# Conv2d module (matches the PyTorch wrapper semantics, inference mode)
# ---------------------------------------------------------------------------
class Conv2dPallas:
    def __init__(self, in_channels, out_channels, kernel_size, stride=1,
                 relu=True, same_padding=False, bn=False, *, key):
        self.in_channels = in_channels
        self.out_channels = out_channels
        self.kernel_size = kernel_size
        self.stride = stride
        self.padding = int((kernel_size - 1) / 2) if same_padding else 0
        self.relu = relu
        self.bn = bn
        self.eps = 0.001

        k_w, k_b, k_g, k_beta = jax.random.split(key, 4)
        # PyTorch conv weight layout: (OC, IC, KH, KW)
        fan_in = in_channels * kernel_size * kernel_size
        bound = 1.0 / jnp.sqrt(fan_in)
        self.weight = jax.random.uniform(
            k_w, (out_channels, in_channels, kernel_size, kernel_size),
            minval=-bound, maxval=bound, dtype=jnp.float32)
        self.bias = jax.random.uniform(
            k_b, (out_channels,), minval=-bound, maxval=bound,
            dtype=jnp.float32)

        if bn:
            # Inference-mode BatchNorm2d(eps=0.001, momentum=0, affine=True).
            # TODO(synk): training-mode batch statistics are not implemented;
            # running stats are used (deterministic synthetic values here).
            self.gamma = 1.0 + 0.1 * jax.random.normal(
                k_g, (out_channels,), dtype=jnp.float32)
            self.beta = 0.1 * jax.random.normal(
                k_beta, (out_channels,), dtype=jnp.float32)
            self.running_mean = jnp.zeros((out_channels,), jnp.float32)
            self.running_var = jnp.ones((out_channels,), jnp.float32)

        # Jit the whole forward so patch extraction, bf16 casts, pads and the
        # boundary transposes fuse around the pallas_call.
        self._forward = jax.jit(self._forward_impl)

    def _forward_impl(self, x):
        # x: (N, C, H, W) float32
        N, C, H, W = x.shape
        KH = KW = self.kernel_size
        s, p = self.stride, self.padding
        OH = (H + 2 * p - KH) // s + 1
        OW = (W + 2 * p - KW) // s + 1
        OC = self.out_channels
        K = C * KH * KW
        M = N * OH * OW

        # --- im2col: single XLA-fused patch extraction, bf16, NHWC patches.
        # Output (N, OH, OW, C*KH*KW); feature index = c*KH*KW + kh*KW + kw.
        patches = jax.lax.conv_general_dilated_patches(
            x.astype(jnp.bfloat16),
            filter_shape=(KH, KW),
            window_strides=(s, s),
            padding=[(p, p), (p, p)],
            dimension_numbers=("NCHW", "OIHW", "NHWC"))
        x_col = patches.reshape(M, K)          # contiguous reshape

        # --- weight matrix (K, OC) in the same (c, kh, kw) ordering, bf16.
        w_mat = self.weight.reshape(OC, K).T.astype(jnp.bfloat16)

        # --- fold conv bias (and BN if enabled) into per-channel scale/shift.
        if self.bn:
            scale = self.gamma / jnp.sqrt(self.running_var + self.eps)
            shift = scale * (self.bias - self.running_mean) + self.beta
        else:
            scale = jnp.ones((OC,), jnp.float32)
            shift = self.bias

        # --- pad OC to a 128-multiple so output tiles are lane-dense.
        # Padded weight columns / scale / shift are ZERO and sliced off below.
        OCp = _round_up(OC, 128)
        if OCp != OC:
            w_mat = jnp.pad(w_mat, ((0, 0), (0, OCp - OC)))
            scale = jnp.pad(scale, (0, OCp - OC))
            shift = jnp.pad(shift, (0, OCp - OC))
        scale = scale.reshape(1, OCp).astype(jnp.float32)
        shift = shift.reshape(1, OCp).astype(jnp.float32)

        y = _fused_conv_gemm(x_col, w_mat, scale, shift, relu=self.relu)
        y = y[:, :OC].reshape(N, OH, OW, OC)   # natural NHWC result
        # PyTorch contract is NCHW; single layout change at the boundary.
        return jnp.transpose(y, (0, 3, 1, 2))

    def __call__(self, x):
        return self._forward(x)


# ---------------------------------------------------------------------------
# Pure-JAX f32 reference for verification
# ---------------------------------------------------------------------------
def _reference(mod, x):
    y = jax.lax.conv_general_dilated(
        x, mod.weight,
        window_strides=(mod.stride, mod.stride),
        padding=[(mod.padding, mod.padding)] * 2,
        dimension_numbers=("NCHW", "OIHW", "NCHW"))
    y = y + mod.bias.reshape(1, -1, 1, 1)
    if mod.bn:
        scale = mod.gamma / jnp.sqrt(mod.running_var + mod.eps)
        y = (y - mod.running_mean.reshape(1, -1, 1, 1)) * \
            scale.reshape(1, -1, 1, 1) + mod.beta.reshape(1, -1, 1, 1)
    if mod.relu:
        y = jnp.maximum(y, 0.0)
    return y


if __name__ == "__main__":
    key = jax.random.PRNGKey(0)
    k_x, k_p1, k_p2 = jax.random.split(key, 3)

    # Small NCHW input consistent with a Conv2d(in=4, out=8, k=3) layer.
    x = jax.random.normal(k_x, (2, 4, 16, 16), dtype=jnp.float32)

    # bf16 MXU matmul (f32 accumulation) -> relaxed tolerance vs f32 reference.
    TOL = dict(atol=5e-2, rtol=5e-2)

    # Default flavor: relu=True, same_padding=True, bn=False.
    conv = Conv2dPallas(4, 8, 3, stride=1, relu=True, same_padding=True,
                        bn=False, key=k_p1)
    out = conv(x)
    jax.block_until_ready(out)
    ref = _reference(conv, x)
    assert out.shape == ref.shape == (2, 8, 16, 16)
    assert jnp.allclose(out, ref, **TOL), float(jnp.max(jnp.abs(out - ref)))

    # BN-enabled flavor, stride 2, no same padding.
    conv_bn = Conv2dPallas(4, 8, 3, stride=2, relu=True, same_padding=False,
                           bn=True, key=k_p2)
    out_bn = conv_bn(x)
    jax.block_until_ready(out_bn)
    ref_bn = _reference(conv_bn, x)
    assert out_bn.shape == ref_bn.shape == (2, 8, 7, 7)
    assert jnp.allclose(out_bn, ref_bn, **TOL), \
        float(jnp.max(jnp.abs(out_bn - ref_bn)))

    print("KERNEL_OK")
</pallas_src>

<mosaic_0001>
module attributes {stable_mosaic.version = 11 : i64} {
  func.func @_conv_gemm_kernel(%arg0: i32, %arg1: i32, %arg2: i32, %arg3: memref<512x36xbf16, #tpu.memory_space<vmem>>, %arg4: memref<36x128xbf16, #tpu.memory_space<vmem>>, %arg5: memref<1x128xf32, #tpu.memory_space<vmem>>, %arg6: memref<1x128xf32, #tpu.memory_space<vmem>>, %arg7: memref<512x128xf32, #tpu.memory_space<vmem>>, %arg8: memref<512x128xf32, #tpu.memory_space<vmem>>) attributes {dimension_semantics = [#tpu.dimension_semantics<parallel>, #tpu.dimension_semantics<parallel>, #tpu.dimension_semantics<arbitrary>], iteration_bounds = array<i64: 1, 1, 1>, scalar_prefetch = 0 : i64, scratch_operands = 1 : i64, tpu.core_type = #tpu.core_type<tc>, window_params = [{transform_indices = @transform_0, window_bounds = array<i64: 512, 36>}, {transform_indices = @transform_1, window_bounds = array<i64: 36, 128>}, {transform_indices = @transform_2, window_bounds = array<i64: 1, 128>}, {transform_indices = @transform_3, window_bounds = array<i64: 1, 128>}, {transform_indices = @transform_4, window_bounds = array<i64: 512, 128>}]} {
    %c0_i32 = arith.constant 0 : i32
    %0 = arith.cmpi eq, %arg2, %c0_i32 : i32
    %1 = arith.extui %0 : i1 to i32
    %c0_i32_0 = arith.constant 0 : i32
    %2 = arith.cmpi ne, %1, %c0_i32_0 : i32
    scf.if %2 {
      %cst_10 = arith.constant 0.000000e+00 : f32
      %12 = vector.broadcast %cst_10 : f32 to vector<512x128xf32>
      %c0_11 = arith.constant 0 : index
      %c0_12 = arith.constant 0 : index
      %13 = vector.load %arg8[%c0_11, %c0_12] : memref<512x128xf32, #tpu.memory_space<vmem>>, vector<512x128xf32>
      tpu.vector_store %arg8[%c0_11, %c0_12], %12 {strides = array<i32>} : memref<512x128xf32, #tpu.memory_space<vmem>>, vector<512x128xf32>,
    } else {
    }
    %c0 = arith.constant 0 : index
    %c0_1 = arith.constant 0 : index
    %3 = vector.load %arg8[%c0, %c0_1] : memref<512x128xf32, #tpu.memory_space<vmem>>, vector<512x128xf32>
    %c0_2 = arith.constant 0 : index
    %c0_3 = arith.constant 0 : index
    %4 = vector.load %arg3[%c0_2, %c0_3] : memref<512x36xbf16, #tpu.memory_space<vmem>>, vector<512x36xbf16>
    %c0_4 = arith.constant 0 : index
    %c0_5 = arith.constant 0 : index
    %5 = vector.load %arg4[%c0_4, %c0_5] : memref<36x128xbf16, #tpu.memory_space<vmem>>, vector<36x128xbf16>
    %cst = arith.constant dense<0.000000e+00> : vector<512x128xf32>
    %6 = tpu.matmul %4, %5, %cst {dimension_numbers = #tpu.dot_dimension_numbers<[1], [0], [0], [1], [0, 0, 1, 1], [], []>} : vector<512x36xbf16>, vector<36x128xbf16>, vector<512x128xf32> -> vector<512x128xf32>
    %7 = arith.addf %3, %6 : vector<512x128xf32>
    %c0_6 = arith.constant 0 : index
    %c0_7 = arith.constant 0 : index
    %8 = vector.load %arg8[%c0_6, %c0_7] : memref<512x128xf32, #tpu.memory_space<vmem>>, vector<512x128xf32>
    tpu.vector_store %arg8[%c0_6, %c0_7], %7 {strides = array<i32>} : memref<512x128xf32, #tpu.memory_space<vmem>>, vector<512x128xf32>,
    %c0_i32_8 = arith.constant 0 : i32
    %9 = arith.cmpi eq, %arg2, %c0_i32_8 : i32
    %10 = arith.extui %9 : i1 to i32
    %c0_i32_9 = arith.constant 0 : i32
    %11 = arith.cmpi ne, %10, %c0_i32_9 : i32
    scf.if %11 {
      %c0_10 = arith.constant 0 : index
      %c0_11 = arith.constant 0 : index
      %12 = vector.load %arg8[%c0_10, %c0_11] : memref<512x128xf32, #tpu.memory_space<vmem>>, vector<512x128xf32>
      %c0_12 = arith.constant 0 : index
      %c0_13 = arith.constant 0 : index
      %13 = vector.load %arg5[%c0_12, %c0_13] : memref<1x128xf32, #tpu.memory_space<vmem>>, vector<1x128xf32>
      %14 = vector.broadcast %13 : vector<1x128xf32> to vector<512x128xf32>
      %15 = arith.mulf %12, %14 : vector<512x128xf32>
      %c0_14 = arith.constant 0 : index
      %c0_15 = arith.constant 0 : index
      %16 = vector.load %arg6[%c0_14, %c0_15] : memref<1x128xf32, #tpu.memory_space<vmem>>, vector<1x128xf32>
      %17 = vector.broadcast %16 : vector<1x128xf32> to vector<512x128xf32>
      %18 = arith.addf %15, %17 : vector<512x128xf32>
      %cst_16 = arith.constant 0.000000e+00 : f32
      %19 = vector.broadcast %cst_16 : f32 to vector<512x128xf32>
      %20 = arith.maximumf %18, %19 : vector<512x128xf32>
      %c0_17 = arith.constant 0 : index
      %c0_18 = arith.constant 0 : index
      %21 = vector.load %arg7[%c0_17, %c0_18] : memref<512x128xf32, #tpu.memory_space<vmem>>, vector<512x128xf32>
      tpu.vector_store %arg7[%c0_17, %c0_18], %20 {strides = array<i32>} : memref<512x128xf32, #tpu.memory_space<vmem>>, vector<512x128xf32>,
    } else {
    }
    return
  }
  func.func @transform_0(%arg0: i32, %arg1: i32, %arg2: i32) -> (i32, i32) {
    %c0_i32 = arith.constant 0 : i32
    return %arg0, %arg2 : i32, i32
  }
  func.func @transform_1(%arg0: i32, %arg1: i32, %arg2: i32) -> (i32, i32) {
    %c0_i32 = arith.constant 0 : i32
    return %arg2, %arg1 : i32, i32
  }
  func.func @transform_2(%arg0: i32, %arg1: i32, %arg2: i32) -> (i32, i32) {
    %c0_i32 = arith.constant 0 : i32
    %c0_i32_0 = arith.constant 0 : i32
    return %c0_i32, %arg1 : i32, i32
  }
  func.func @transform_3(%arg0: i32, %arg1: i32, %arg2: i32) -> (i32, i32) {
    %c0_i32 = arith.constant 0 : i32
    %c0_i32_0 = arith.constant 0 : i32
    return %c0_i32, %arg1 : i32, i32
  }
  func.func @transform_4(%arg0: i32, %arg1: i32, %arg2: i32) -> (i32, i32) {
    %c0_i32 = arith.constant 0 : i32
    return %arg0, %arg1 : i32, i32
  }
}

</mosaic_0001>

<bundles_post_ra>
// kernel: _forward_impl.1
= control target key start
LH: loop header
LB: loop body
LE: loop exit
PB: predicated region body
PF: predicated region fallthrough
CT: control target
= control target key end

     0   :  { %vm394_vm0 = vcmask 293888   ;;  %vm491_vm1 = vcmask 1041408   ;;  %s1962_s1 = inlined_call_operand.vmem [shape: bf16[36,128], index: 1, kind: input, shape index: {}]   ;;  %s1963_s0 = inlined_call_operand.vmem [shape: bf16[512,36], index: 0, kind: input, shape index: {}]   ;;  %s1964_s2 = inlined_call_operand.vmem [shape: f32[1,128], index: 2, kind: input, shape index: {}]   ;;  %s1965_s3 = inlined_call_operand.vmem [shape: f32[1,128], index: 3, kind: input, shape index: {}]   ;;  %s1966_s4 = inlined_call_operand.vmem [shape: f32[512,128], index: 4, kind: output, shape index: {}]  }
   0x1   :  { %v1435_v0 = vld [vmem:[%s1962_s1] sm:$0xff]   ;;  %v1436_v1 = vld [vmem:[%s1962_s1 + $0x8] sm:$0xff]   ;;  %v1437_v2 = vld [vmem:[%s1962_s1 + $0x10] ss:$0 sps:$4 sm:$0x33]  }
   0x2   :  { %1357 = vmatprep.subr.bf16.mxu0 %v1435_v0  ;;  %1427 = vmatprep.subr.bf16.mxu1 %v1435_v0  ;;  %v1438_v3 = vld [vmem:[%s1963_s0] sm:$0xff]   ;;  %v493_v5 = vsel %vm491_vm1, %v1437_v2, 0  ;;  %v1440_v6 = vld [vmem:[%s1963_s0 + $0x8] sm:$0xff]   ;;  %v1442_v8 = vld [vmem:[%s1963_s0 + $0x10] sm:$0xff]  }
   0x3   :  { %1358 = vmatpush3.bf16.msra.mxu0 %v1435_v0  ;;  %1430 = vmatpush3.bf16.msra.mxu1 %v1435_v0  ;;  %v1439_v4 = vld [vmem:[%s1963_s0 + $0x80] sm:$0xff]   ;;  %v1441_v7 = vld [vmem:[%s1963_s0 + $0x88] sm:$0xff]   ;;  %v1443_v9 = vld [vmem:[%s1963_s0 + $0x90] sm:$0xff]  }
   0x4   :  { %1359 = vmatprep.subr.bf16.mxu0 %v1436_v1  ;;  %1428 = vmatprep.subr.bf16.mxu1 %v1436_v1  ;;  %v1444_v10 = vld [vmem:[%s1963_s0 + $0x18] sm:$0xff]   ;;  %v1446_v12 = vld [vmem:[%s1963_s0 + $0x20] sm:$0xff]   ;;  %v1448_v14 = vld [vmem:[%s1963_s0 + $0x28] sm:$0xff]  }
   0x5   :  { %1363 = vmatprep.mubr.msk.bf16.mxu0 %vm394_vm0, %v1438_v3  ;;  %1395 = vmatprep.mubr.msk.bf16.mxu1 %vm394_vm0, %v1439_v4  ;;  %v1445_v11 = vld [vmem:[%s1963_s0 + $0x98] sm:$0xff]   ;;  %v1447_v13 = vld [vmem:[%s1963_s0 + $0xa0] sm:$0xff]   ;;  %v1449_v15 = vld [vmem:[%s1963_s0 + $0xa8] sm:$0xff]  }
   0x6   :  { %v1450_v16 = vld [vmem:[%s1963_s0 + $0x30] sm:$0xff]   ;;  %v1452_v18 = vld [vmem:[%s1963_s0 + $0x38] sm:$0xff]   ;;  %v1454_v20 = vld [vmem:[%s1963_s0 + $0x40] sm:$0xff]  }
   0x7   :  { %1360 = vmatpush3.bf16.msra.mxu0 %v1436_v1  ;;  %1431 = vmatpush3.bf16.msra.mxu1 %v1436_v1  ;;  %v1451_v17 = vld [vmem:[%s1963_s0 + $0xb0] sm:$0xff]   ;;  %v1453_v19 = vld [vmem:[%s1963_s0 + $0xb8] sm:$0xff]   ;;  %v1455_v21 = vld [vmem:[%s1963_s0 + $0xc0] sm:$0xff]  }
   0x8   :  { %1433 = vmatprep.subr.msk.bf16.mxu0 %vm491_vm1, %v1437_v2  ;;  %1434 = vmatprep.subr.msk.bf16.mxu1 %vm491_vm1, %v1437_v2  ;;  %v1456_v22 = vld [vmem:[%s1963_s0 + $0x48] sm:$0xff]   ;;  %v1458_v24 = vld [vmem:[%s1963_s0 + $0x50] sm:$0xff]   ;;  %v1460_v26 = vld [vmem:[%s1963_s0 + $0x58] sm:$0xff]  }
   0x9   :  { %v1457_v23 = vld [vmem:[%s1963_s0 + $0xc8] sm:$0xff]   ;;  %v1459_v25 = vld [vmem:[%s1963_s0 + $0xd0] sm:$0xff]   ;;  %v1461_v27 = vld [vmem:[%s1963_s0 + $0xd8] sm:$0xff]  }
   0xa   :  { %v1462_v28 = vld [vmem:[%s1963_s0 + $0x60] sm:$0xff]   ;;  %v1464_v30 = vld [vmem:[%s1963_s0 + $0x68] sm:$0xff]   ;;  %v1466_v32 = vld [vmem:[%s1963_s0 + $0x70] sm:$0xff]  }
   0xb   :  { %1362 = vmatpush3.bf16.msra.mxu0 %v493_v5  ;;  %1432 = vmatpush3.bf16.msra.mxu1 %v493_v5  ;;  %v1463_v29 = vld [vmem:[%s1963_s0 + $0xe0] sm:$0xff]   ;;  %v1465_v31 = vld [vmem:[%s1963_s0 + $0xe8] sm:$0xff]   ;;  %v1467_v33 = vld [vmem:[%s1963_s0 + $0xf0] sm:$0xff]  }
   0xc   :  { %v1468_v34 = vld [vmem:[%s1963_s0 + $0x78] sm:$0xff]   ;;  %v1635_v36 = vld [vmem:[%s1964_s2] ss:$0 sm:$0xff] }
   0xd   :  { %v1469_v35 = vld [vmem:[%s1963_s0 + $0xf8] sm:$0xff]   ;;  %v1640_v38 = vld [vmem:[%s1965_s3] ss:$0 sm:$0xff] }
   0xe   :  { %1364 = vmatmul.mubr.msk.bf16.vlgmr.msra.gmra.mrb[0].mxu0 %vm394_vm0, %v1440_v6  ;;  %1396 = vmatmul.mubr.msk.bf16.vlgmr.msra.gmra.mrb[0].mxu1 %vm394_vm0, %v1441_v7 }
   0xf   :  { %1367 = vmatprep.mubr.msk.bf16.mxu0 %vm394_vm0, %v1442_v8  ;;  %1399 = vmatprep.mubr.msk.bf16.mxu1 %vm394_vm0, %v1443_v9 }
  0x16   :  { %1368 = vmatmul.mubr.msk.bf16.gmra.mrb[4].mxu0 %vm394_vm0, %v1444_v10  ;;  %1400 = vmatmul.mubr.msk.bf16.gmra.mrb[4].mxu1 %vm394_vm0, %v1445_v11 }
  0x17   :  { %1371 = vmatprep.mubr.msk.bf16.mxu0 %vm394_vm0, %v1446_v12  ;;  %1403 = vmatprep.mubr.msk.bf16.mxu1 %vm394_vm0, %v1447_v13 }
  0x1e   :  { %1372 = vmatmul.mubr.msk.bf16.gmra.mrb[8].mxu0 %vm394_vm0, %v1448_v14  ;;  %1404 = vmatmul.mubr.msk.bf16.gmra.mrb[8].mxu1 %vm394_vm0, %v1449_v15 }
  0x1f   :  { %1375 = vmatprep.mubr.msk.bf16.mxu0 %vm394_vm0, %v1450_v16  ;;  %1407 = vmatprep.mubr.msk.bf16.mxu1 %vm394_vm0, %v1451_v17 }
  0x26   :  { %1376 = vmatmul.mubr.msk.bf16.gmra.mrb[12].mxu0 %vm394_vm0, %v1452_v18  ;;  %1408 = vmatmul.mubr.msk.bf16.gmra.mrb[12].mxu1 %vm394_vm0, %v1453_v19 }
  0x27   :  { %1379 = vmatprep.mubr.msk.bf16.mxu0 %vm394_vm0, %v1454_v20  ;;  %1411 = vmatprep.mubr.msk.bf16.mxu1 %vm394_vm0, %v1455_v21 }
  0x2e   :  { %1380 = vmatmul.mubr.msk.bf16.gmra.mrb[16].mxu0 %vm394_vm0, %v1456_v22  ;;  %1412 = vmatmul.mubr.msk.bf16.gmra.mrb[16].mxu1 %vm394_vm0, %v1457_v23 }
  0x2f   :  { %1383 = vmatprep.mubr.msk.bf16.mxu0 %vm394_vm0, %v1458_v24  ;;  %1415 = vmatprep.mubr.msk.bf16.mxu1 %vm394_vm0, %v1459_v25 }
  0x36   :  { %1384 = vmatmul.mubr.msk.bf16.gmra.mrb[20].mxu0 %vm394_vm0, %v1460_v26  ;;  %1416 = vmatmul.mubr.msk.bf16.gmra.mrb[20].mxu1 %vm394_vm0, %v1461_v27 }
  0x37   :  { %1387 = vmatprep.mubr.msk.bf16.mxu0 %vm394_vm0, %v1462_v28  ;;  %1419 = vmatprep.mubr.msk.bf16.mxu1 %vm394_vm0, %v1463_v29 }
  0x3e   :  { %1388 = vmatmul.mubr.msk.bf16.gmra.mrb[24].mxu0 %vm394_vm0, %v1464_v30  ;;  %1420 = vmatmul.mubr.msk.bf16.gmra.mrb[24].mxu1 %vm394_vm0, %v1465_v31 }
  0x3f   :  { %1391 = vmatprep.mubr.msk.bf16.mxu0 %vm394_vm0, %v1466_v32  ;;  %1423 = vmatprep.mubr.msk.bf16.mxu1 %vm394_vm0, %v1467_v33 }
  0x46   :  { %1392 = vmatmul.mubr.msk.bf16.gmra.mrb[28].mxu0 %vm394_vm0, %v1468_v34  ;;  %1424 = vmatmul.mubr.msk.bf16.gmra.mrb[28].mxu1 %vm394_vm0, %v1469_v35 }
  0xe1   :  { %v1365_v37 = vpop.f32.mrb[0].mxu0  ;;  %v1397_v39 = vpop.f32.mrb[0].mxu1 }
  0xe2   :  { %v988_v40 = vmul.f32 %v1365_v37, %v1635_v36  ;;  %v1020_v41 = vmul.f32 %v1397_v39, %v1635_v36  ;;  %v529_v42 = vpop.f32.mrb[1].mxu0  ;;  %v657_v43 = vpop.f32.mrb[1].mxu1 }
  0xe3   :  { %v986_v44 = vmul.f32 %v1635_v36, %v529_v42  ;;  %v1018_v45 = vmul.f32 %v1635_v36, %v657_v43  ;;  %v1366_v46 = vpop.f32.mrb[2].mxu0  ;;  %v1398_v47 = vpop.f32.mrb[2].mxu1 }
  0xe4   :  { %v1059_v48 = vadd.f32 %v1640_v38, %v988_v40  ;;  %v1091_v49 = vadd.f32 %v1640_v38, %v1020_v41  ;;  %v989_v50 = vmul.f32 %v1366_v46, %v1635_v36  ;;  %v1021_v51 = vmul.f32 %v1398_v47, %v1635_v36  ;;  %v532_v52 = vpop.f32.mrb[3].mxu0  ;;  %v660_v53 = vpop.f32.mrb[3].mxu1 }
  0xe5   :  { %v1057_v54 = vadd.f32 %v1640_v38, %v986_v44  ;;  %v1089_v55 = vadd.f32 %v1640_v38, %v1018_v45  ;;  %v987_v56 = vmul.f32 %v1635_v36, %v532_v52  ;;  %v1019_v57 = vmul.f32 %v1635_v36, %v660_v53 }
  0xe6   :  { %v1123_v58 = vmax.f32 %v1059_v48, 0.0  ;;  %v1155_v59 = vmax.f32 %v1091_v49, 0.0  ;;  %v1060_v60 = vadd.f32 %v1640_v38, %v989_v50  ;;  %v1092_v61 = vadd.f32 %v1640_v38, %v1021_v51 }
  0xe7   :  { %v1121_v62 = vmax.f32 %v1057_v54, 0.0  ;;  %v1153_v63 = vmax.f32 %v1089_v55, 0.0  ;;  %v1058_v0 = vadd.f32 %v1640_v38, %v987_v56  ;;  %v1090_v1 = vadd.f32 %v1640_v38, %v1019_v57 }
  0xe8   :  { %1187 = vst [vmem:[%s1966_s4 + $0x10] sm:$0xff] %v1123_v58  ;;  %1219 = vst [vmem:[%s1966_s4 + $0x110] sm:$0xff] %v1155_v59  ;;  %v1124_v2 = vmax.f32 %v1060_v60, 0.0  ;;  %v1156_v3 = vmax.f32 %v1092_v61, 0.0 }
  0xe9   :  { %1185 = vst [vmem:[%s1966_s4] sm:$0xff] %v1121_v62  ;;  %1217 = vst [vmem:[%s1966_s4 + $0x100] sm:$0xff] %v1153_v63  ;;  %v1122_v4 = vmax.f32 %v1058_v0, 0.0  ;;  %v1154_v5 = vmax.f32 %v1090_v1, 0.0  ;;  %v1369_v6 = vpop.f32.mrb[4].mxu0  ;;  %v1401_v7 = vpop.f32.mrb[4].mxu1 }
  0xea   :  { %1188 = vst [vmem:[%s1966_s4 + $0x18] sm:$0xff] %v1124_v2  ;;  %1220 = vst [vmem:[%s1966_s4 + $0x118] sm:$0xff] %v1156_v3  ;;  %v992_v8 = vmul.f32 %v1369_v6, %v1635_v36  ;;  %v1024_v9 = vmul.f32 %v1401_v7, %v1635_v36  ;;  %v545_v10 = vpop.f32.mrb[5].mxu0  ;;  %v673_v11 = vpop.f32.mrb[5].mxu1 }
  0xeb   :  { %1186 = vst [vmem:[%s1966_s4 + $0x8] sm:$0xff] %v1122_v4  ;;  %1218 = vst [vmem:[%s1966_s4 + $0x108] sm:$0xff] %v1154_v5  ;;  %v990_v12 = vmul.f32 %v1635_v36, %v545_v10  ;;  %v1022_v13 = vmul.f32 %v1635_v36, %v673_v11  ;;  %v1370_v14 = vpop.f32.mrb[6].mxu0  ;;  %v1402_v15 = vpop.f32.mrb[6].mxu1 }
  0xec   :  { %v1063_v16 = vadd.f32 %v1640_v38, %v992_v8  ;;  %v1095_v17 = vadd.f32 %v1640_v38, %v1024_v9  ;;  %v993_v18 = vmul.f32 %v1370_v14, %v1635_v36  ;;  %v1025_v19 = vmul.f32 %v1402_v15, %v1635_v36  ;;  %v548_v20 = vpop.f32.mrb[7].mxu0  ;;  %v676_v21 = vpop.f32.mrb[7].mxu1 }
  0xed   :  { %v1061_v22 = vadd.f32 %v1640_v38, %v990_v12  ;;  %v1093_v23 = vadd.f32 %v1640_v38, %v1022_v13  ;;  %v991_v24 = vmul.f32 %v1635_v36, %v548_v20  ;;  %v1023_v25 = vmul.f32 %v1635_v36, %v676_v21 }
  0xee   :  { %v1127_v26 = vmax.f32 %v1063_v16, 0.0  ;;  %v1159_v27 = vmax.f32 %v1095_v17, 0.0  ;;  %v1064_v28 = vadd.f32 %v1640_v38, %v993_v18  ;;  %v1096_v29 = vadd.f32 %v1640_v38, %v1025_v19 }
  0xef   :  { %v1125_v30 = vmax.f32 %v1061_v22, 0.0  ;;  %v1157_v31 = vmax.f32 %v1093_v23, 0.0  ;;  %v1062_v32 = vadd.f32 %v1640_v38, %v991_v24  ;;  %v1094_v33 = vadd.f32 %v1640_v38, %v1023_v25 }
  0xf0   :  { %1191 = vst [vmem:[%s1966_s4 + $0x30] sm:$0xff] %v1127_v26  ;;  %1223 = vst [vmem:[%s1966_s4 + $0x130] sm:$0xff] %v1159_v27  ;;  %v1128_v34 = vmax.f32 %v1064_v28, 0.0  ;;  %v1160_v35 = vmax.f32 %v1096_v29, 0.0 }
  0xf1   :  { %1189 = vst [vmem:[%s1966_s4 + $0x20] sm:$0xff] %v1125_v30  ;;  %1221 = vst [vmem:[%s1966_s4 + $0x120] sm:$0xff] %v1157_v31  ;;  %v1126_v37 = vmax.f32 %v1062_v32, 0.0  ;;  %v1158_v39 = vmax.f32 %v1094_v33, 0.0  ;;  %v1373_v40 = vpop.f32.mrb[8].mxu0  ;;  %v1405_v41 = vpop.f32.mrb[8].mxu1 }
  0xf2   :  { %1192 = vst [vmem:[%s1966_s4 + $0x38] sm:$0xff] %v1128_v34  ;;  %1224 = vst [vmem:[%s1966_s4 + $0x138] sm:$0xff] %v1160_v35  ;;  %v996_v42 = vmul.f32 %v1373_v40, %v1635_v36  ;;  %v1028_v43 = vmul.f32 %v1405_v41, %v1635_v36  ;;  %v561_v44 = vpop.f32.mrb[9].mxu0  ;;  %v689_v45 = vpop.f32.mrb[9].mxu1 }
  0xf3   :  { %1190 = vst [vmem:[%s1966_s4 + $0x28] sm:$0xff] %v1126_v37  ;;  %1222 = vst [vmem:[%s1966_s4 + $0x128] sm:$0xff] %v1158_v39  ;;  %v994_v46 = vmul.f32 %v1635_v36, %v561_v44  ;;  %v1026_v47 = vmul.f32 %v1635_v36, %v689_v45  ;;  %v1374_v48 = vpop.f32.mrb[10].mxu0  ;;  %v1406_v49 = vpop.f32.mrb[10].mxu1 }
  0xf4   :  { %v1067_v50 = vadd.f32 %v1640_v38, %v996_v42  ;;  %v1099_v51 = vadd.f32 %v1640_v38, %v1028_v43  ;;  %v997_v52 = vmul.f32 %v1374_v48, %v1635_v36  ;;  %v1029_v53 = vmul.f32 %v1406_v49, %v1635_v36  ;;  %v564_v54 = vpop.f32.mrb[11].mxu0  ;;  %v692_v55 = vpop.f32.mrb[11].mxu1 }
  0xf5   :  { %v1065_v56 = vadd.f32 %v1640_v38, %v994_v46  ;;  %v1097_v57 = vadd.f32 %v1640_v38, %v1026_v47  ;;  %v995_v58 = vmul.f32 %v1635_v36, %v564_v54  ;;  %v1027_v59 = vmul.f32 %v1635_v36, %v692_v55 }
  0xf6   :  { %v1131_v60 = vmax.f32 %v1067_v50, 0.0  ;;  %v1163_v61 = vmax.f32 %v1099_v51, 0.0  ;;  %v1068_v62 = vadd.f32 %v1640_v38, %v997_v52  ;;  %v1100_v63 = vadd.f32 %v1640_v38, %v1029_v53 }
  0xf7   :  { %v1129_v0 = vmax.f32 %v1065_v56, 0.0  ;;  %v1161_v1 = vmax.f32 %v1097_v57, 0.0  ;;  %v1066_v2 = vadd.f32 %v1640_v38, %v995_v58  ;;  %v1098_v3 = vadd.f32 %v1640_v38, %v1027_v59 }
  0xf8   :  { %1195 = vst [vmem:[%s1966_s4 + $0x50] sm:$0xff] %v1131_v60  ;;  %1227 = vst [vmem:[%s1966_s4 + $0x150] sm:$0xff] %v1163_v61  ;;  %v1132_v4 = vmax.f32 %v1068_v62, 0.0  ;;  %v1164_v5 = vmax.f32 %v1100_v63, 0.0 }
  0xf9   :  { %1193 = vst [vmem:[%s1966_s4 + $0x40] sm:$0xff] %v1129_v0  ;;  %1225 = vst [vmem:[%s1966_s4 + $0x140] sm:$0xff] %v1161_v1  ;;  %v1130_v6 = vmax.f32 %v1066_v2, 0.0  ;;  %v1162_v7 = vmax.f32 %v1098_v3, 0.0  ;;  %v1377_v8 = vpop.f32.mrb[12].mxu0  ;;  %v1409_v9 = vpop.f32.mrb[12].mxu1 }
  0xfa   :  { %1196 = vst [vmem:[%s1966_s4 + $0x58] sm:$0xff] %v1132_v4  ;;  %1228 = vst [vmem:[%s1966_s4 + $0x158] sm:$0xff] %v1164_v5  ;;  %v1000_v10 = vmul.f32 %v1377_v8, %v1635_v36  ;;  %v1032_v11 = vmul.f32 %v1409_v9, %v1635_v36  ;;  %v577_v12 = vpop.f32.mrb[13].mxu0  ;;  %v705_v13 = vpop.f32.mrb[13].mxu1 }
  0xfb   :  { %1194 = vst [vmem:[%s1966_s4 + $0x48] sm:$0xff] %v1130_v6  ;;  %1226 = vst [vmem:[%s1966_s4 + $0x148] sm:$0xff] %v1162_v7  ;;  %v998_v14 = vmul.f32 %v1635_v36, %v577_v12  ;;  %v1030_v15 = vmul.f32 %v1635_v36, %v705_v13  ;;  %v1378_v16 = vpop.f32.mrb[14].mxu0  ;;  %v1410_v17 = vpop.f32.mrb[14].mxu1 }
  0xfc   :  { %v1071_v18 = vadd.f32 %v1640_v38, %v1000_v10  ;;  %v1103_v19 = vadd.f32 %v1640_v38, %v1032_v11  ;;  %v1001_v20 = vmul.f32 %v1378_v16, %v1635_v36  ;;  %v1033_v21 = vmul.f32 %v1410_v17, %v1635_v36  ;;  %v580_v22 = vpop.f32.mrb[15].mxu0  ;;  %v708_v23 = vpop.f32.mrb[15].mxu1 }
  0xfd   :  { %v1069_v24 = vadd.f32 %v1640_v38, %v998_v14  ;;  %v1101_v25 = vadd.f32 %v1640_v38, %v1030_v15  ;;  %v999_v26 = vmul.f32 %v1635_v36, %v580_v22  ;;  %v1031_v27 = vmul.f32 %v1635_v36, %v708_v23 }
  0xfe   :  { %v1135_v28 = vmax.f32 %v1071_v18, 0.0  ;;  %v1167_v29 = vmax.f32 %v1103_v19, 0.0  ;;  %v1072_v30 = vadd.f32 %v1640_v38, %v1001_v20  ;;  %v1104_v31 = vadd.f32 %v1640_v38, %v1033_v21 }
  0xff   :  { %v1133_v32 = vmax.f32 %v1069_v24, 0.0  ;;  %v1165_v33 = vmax.f32 %v1101_v25, 0.0  ;;  %v1070_v34 = vadd.f32 %v1640_v38, %v999_v26  ;;  %v1102_v35 = vadd.f32 %v1640_v38, %v1031_v27 }
 0x100   :  { %1199 = vst [vmem:[%s1966_s4 + $0x70] sm:$0xff] %v1135_v28  ;;  %1231 = vst [vmem:[%s1966_s4 + $0x170] sm:$0xff] %v1167_v29  ;;  %v1136_v37 = vmax.f32 %v1072_v30, 0.0  ;;  %v1168_v39 = vmax.f32 %v1104_v31, 0.0 }
 0x101   :  { %1197 = vst [vmem:[%s1966_s4 + $0x60] sm:$0xff] %v1133_v32  ;;  %1229 = vst [vmem:[%s1966_s4 + $0x160] sm:$0xff] %v1165_v33  ;;  %v1134_v40 = vmax.f32 %v1070_v34, 0.0  ;;  %v1166_v41 = vmax.f32 %v1102_v35, 0.0  ;;  %v1381_v42 = vpop.f32.mrb[16].mxu0  ;;  %v1413_v43 = vpop.f32.mrb[16].mxu1 }
 0x102   :  { %1200 = vst [vmem:[%s1966_s4 + $0x78] sm:$0xff] %v1136_v37  ;;  %1232 = vst [vmem:[%s1966_s4 + $0x178] sm:$0xff] %v1168_v39  ;;  %v1004_v44 = vmul.f32 %v1381_v42, %v1635_v36  ;;  %v1036_v45 = vmul.f32 %v1413_v43, %v1635_v36  ;;  %v593_v46 = vpop.f32.mrb[17].mxu0  ;;  %v721_v47 = vpop.f32.mrb[17].mxu1 }
 0x103   :  { %1198 = vst [vmem:[%s1966_s4 + $0x68] sm:$0xff] %v1134_v40  ;;  %1230 = vst [vmem:[%s1966_s4 + $0x168] sm:$0xff] %v1166_v41  ;;  %v1002_v48 = vmul.f32 %v1635_v36, %v593_v46  ;;  %v1034_v49 = vmul.f32 %v1635_v36, %v721_v47  ;;  %v1382_v50 = vpop.f32.mrb[18].mxu0  ;;  %v1414_v51 = vpop.f32.mrb[18].mxu1 }
 0x104   :  { %v1075_v52 = vadd.f32 %v1640_v38, %v1004_v44  ;;  %v1107_v53 = vadd.f32 %v1640_v38, %v1036_v45  ;;  %v1005_v54 = vmul.f32 %v1382_v50, %v1635_v36  ;;  %v1037_v55 = vmul.f32 %v1414_v51, %v1635_v36  ;;  %v596_v56 = vpop.f32.mrb[19].mxu0  ;;  %v724_v57 = vpop.f32.mrb[19].mxu1 }
 0x105   :  { %v1073_v58 = vadd.f32 %v1640_v38, %v1002_v48  ;;  %v1105_v59 = vadd.f32 %v1640_v38, %v1034_v49  ;;  %v1003_v60 = vmul.f32 %v1635_v36, %v596_v56  ;;  %v1035_v61 = vmul.f32 %v1635_v36, %v724_v57 }
 0x106   :  { %v1139_v62 = vmax.f32 %v1075_v52, 0.0  ;;  %v1171_v63 = vmax.f32 %v1107_v53, 0.0  ;;  %v1076_v0 = vadd.f32 %v1640_v38, %v1005_v54  ;;  %v1108_v1 = vadd.f32 %v1640_v38, %v1037_v55 }
 0x107   :  { %v1137_v2 = vmax.f32 %v1073_v58, 0.0  ;;  %v1169_v3 = vmax.f32 %v1105_v59, 0.0  ;;  %v1074_v4 = vadd.f32 %v1640_v38, %v1003_v60  ;;  %v1106_v5 = vadd.f32 %v1640_v38, %v1035_v61 }
 0x108   :  { %1203 = vst [vmem:[%s1966_s4 + $0x90] sm:$0xff] %v1139_v62  ;;  %1235 = vst [vmem:[%s1966_s4 + $0x190] sm:$0xff] %v1171_v63  ;;  %v1140_v6 = vmax.f32 %v1076_v0, 0.0  ;;  %v1172_v7 = vmax.f32 %v1108_v1, 0.0 }
 0x109   :  { %1201 = vst [vmem:[%s1966_s4 + $0x80] sm:$0xff] %v1137_v2  ;;  %1233 = vst [vmem:[%s1966_s4 + $0x180] sm:$0xff] %v1169_v3  ;;  %v1138_v8 = vmax.f32 %v1074_v4, 0.0  ;;  %v1170_v9 = vmax.f32 %v1106_v5, 0.0  ;;  %v1385_v10 = vpop.f32.mrb[20].mxu0  ;;  %v1417_v11 = vpop.f32.mrb[20].mxu1 }
 0x10a   :  { %1204 = vst [vmem:[%s1966_s4 + $0x98] sm:$0xff] %v1140_v6  ;;  %1236 = vst [vmem:[%s1966_s4 + $0x198] sm:$0xff] %v1172_v7  ;;  %v1008_v12 = vmul.f32 %v1385_v10, %v1635_v36  ;;  %v1040_v13 = vmul.f32 %v1417_v11, %v1635_v36  ;;  %v609_v14 = vpop.f32.mrb[21].mxu0  ;;  %v737_v15 = vpop.f32.mrb[21].mxu1 }
 0x10b   :  { %1202 = vst [vmem:[%s1966_s4 + $0x88] sm:$0xff] %v1138_v8  ;;  %1234 = vst [vmem:[%s1966_s4 + $0x188] sm:$0xff] %v1170_v9  ;;  %v1006_v16 = vmul.f32 %v1635_v36, %v609_v14  ;;  %v1038_v17 = vmul.f32 %v1635_v36, %v737_v15  ;;  %v1386_v18 = vpop.f32.mrb[22].mxu0  ;;  %v1418_v19 = vpop.f32.mrb[22].mxu1 }
 0x10c   :  { %v1079_v20 = vadd.f32 %v1640_v38, %v1008_v12  ;;  %v1111_v21 = vadd.f32 %v1640_v38, %v1040_v13  ;;  %v1009_v22 = vmul.f32 %v1386_v18, %v1635_v36  ;;  %v1041_v23 = vmul.f32 %v1418_v19, %v1635_v36  ;;  %v612_v24 = vpop.f32.mrb[23].mxu0  ;;  %v740_v25 = vpop.f32.mrb[23].mxu1 }
 0x10d   :  { %v1077_v26 = vadd.f32 %v1640_v38, %v1006_v16  ;;  %v1109_v27 = vadd.f32 %v1640_v38, %v1038_v17  ;;  %v1007_v28 = vmul.f32 %v1635_v36, %v612_v24  ;;  %v1039_v29 = vmul.f32 %v1635_v36, %v740_v25 }
 0x10e   :  { %v1143_v30 = vmax.f32 %v1079_v20, 0.0  ;;  %v1175_v31 = vmax.f32 %v1111_v21, 0.0  ;;  %v1080_v32 = vadd.f32 %v1640_v38, %v1009_v22  ;;  %v1112_v33 = vadd.f32 %v1640_v38, %v1041_v23 }
 0x10f   :  { %v1141_v34 = vmax.f32 %v1077_v26, 0.0  ;;  %v1173_v35 = vmax.f32 %v1109_v27, 0.0  ;;  %v1078_v37 = vadd.f32 %v1640_v38, %v1007_v28  ;;  %v1110_v39 = vadd.f32 %v1640_v38, %v1039_v29 }
 0x110   :  { %1207 = vst [vmem:[%s1966_s4 + $0xb0] sm:$0xff] %v1143_v30  ;;  %1239 = vst [vmem:[%s1966_s4 + $0x1b0] sm:$0xff] %v1175_v31  ;;  %v1144_v40 = vmax.f32 %v1080_v32, 0.0  ;;  %v1176_v41 = vmax.f32 %v1112_v33, 0.0 }
 0x111   :  { %1205 = vst [vmem:[%s1966_s4 + $0xa0] sm:$0xff] %v1141_v34  ;;  %1237 = vst [vmem:[%s1966_s4 + $0x1a0] sm:$0xff] %v1173_v35  ;;  %v1142_v42 = vmax.f32 %v1078_v37, 0.0  ;;  %v1174_v43 = vmax.f32 %v1110_v39, 0.0  ;;  %v1389_v44 = vpop.f32.mrb[24].mxu0  ;;  %v1421_v45 = vpop.f32.mrb[24].mxu1 }
 0x112   :  { %1208 = vst [vmem:[%s1966_s4 + $0xb8] sm:$0xff] %v1144_v40  ;;  %1240 = vst [vmem:[%s1966_s4 + $0x1b8] sm:$0xff] %v1176_v41  ;;  %v1012_v46 = vmul.f32 %v1389_v44, %v1635_v36  ;;  %v1044_v47 = vmul.f32 %v1421_v45, %v1635_v36  ;;  %v625_v48 = vpop.f32.mrb[25].mxu0  ;;  %v753_v49 = vpop.f32.mrb[25].mxu1 }
 0x113   :  { %1206 = vst [vmem:[%s1966_s4 + $0xa8] sm:$0xff] %v1142_v42  ;;  %1238 = vst [vmem:[%s1966_s4 + $0x1a8] sm:$0xff] %v1174_v43  ;;  %v1010_v50 = vmul.f32 %v1635_v36, %v625_v48  ;;  %v1042_v51 = vmul.f32 %v1635_v36, %v753_v49  ;;  %v1390_v52 = vpop.f32.mrb[26].mxu0  ;;  %v1422_v53 = vpop.f32.mrb[26].mxu1 }
 0x114   :  { %v1083_v54 = vadd.f32 %v1640_v38, %v1012_v46  ;;  %v1115_v55 = vadd.f32 %v1640_v38, %v1044_v47  ;;  %v1013_v56 = vmul.f32 %v1390_v52, %v1635_v36  ;;  %v1045_v57 = vmul.f32 %v1422_v53, %v1635_v36  ;;  %v628_v58 = vpop.f32.mrb[27].mxu0  ;;  %v756_v59 = vpop.f32.mrb[27].mxu1 }
 0x115   :  { %v1081_v60 = vadd.f32 %v1640_v38, %v1010_v50  ;;  %v1113_v61 = vadd.f32 %v1640_v38, %v1042_v51  ;;  %v1011_v62 = vmul.f32 %v1635_v36, %v628_v58  ;;  %v1043_v63 = vmul.f32 %v1635_v36, %v756_v59 }
 0x116   :  { %v1147_v0 = vmax.f32 %v1083_v54, 0.0  ;;  %v1179_v1 = vmax.f32 %v1115_v55, 0.0  ;;  %v1084_v2 = vadd.f32 %v1640_v38, %v1013_v56  ;;  %v1116_v3 = vadd.f32 %v1640_v38, %v1045_v57 }
 0x117   :  { %v1145_v4 = vmax.f32 %v1081_v60, 0.0  ;;  %v1177_v5 = vmax.f32 %v1113_v61, 0.0  ;;  %v1082_v6 = vadd.f32 %v1640_v38, %v1011_v62  ;;  %v1114_v7 = vadd.f32 %v1640_v38, %v1043_v63 }
 0x118   :  { %1211 = vst [vmem:[%s1966_s4 + $0xd0] sm:$0xff] %v1147_v0  ;;  %1243 = vst [vmem:[%s1966_s4 + $0x1d0] sm:$0xff] %v1179_v1  ;;  %v1148_v8 = vmax.f32 %v1084_v2, 0.0  ;;  %v1180_v9 = vmax.f32 %v1116_v3, 0.0 }
 0x119   :  { %1209 = vst [vmem:[%s1966_s4 + $0xc0] sm:$0xff] %v1145_v4  ;;  %1241 = vst [vmem:[%s1966_s4 + $0x1c0] sm:$0xff] %v1177_v5  ;;  %v1146_v10 = vmax.f32 %v1082_v6, 0.0  ;;  %v1178_v11 = vmax.f32 %v1114_v7, 0.0  ;;  %v1393_v12 = vpop.f32.mrb[28].mxu0  ;;  %v1425_v13 = vpop.f32.mrb[28].mxu1 }
 0x11a   :  { %1212 = vst [vmem:[%s1966_s4 + $0xd8] sm:$0xff] %v1148_v8  ;;  %1244 = vst [vmem:[%s1966_s4 + $0x1d8] sm:$0xff] %v1180_v9  ;;  %v1016_v14 = vmul.f32 %v1393_v12, %v1635_v36  ;;  %v1048_v15 = vmul.f32 %v1425_v13, %v1635_v36  ;;  %v641_v16 = vpop.f32.mrb[29].mxu0  ;;  %v769_v17 = vpop.f32.mrb[29].mxu1 }
 0x11b   :  { %1210 = vst [vmem:[%s1966_s4 + $0xc8] sm:$0xff] %v1146_v10  ;;  %1242 = vst [vmem:[%s1966_s4 + $0x1c8] sm:$0xff] %v1178_v11  ;;  %v1014_v18 = vmul.f32 %v1635_v36, %v641_v16  ;;  %v1046_v19 = vmul.f32 %v1635_v36, %v769_v17  ;;  %v1394_v20 = vpop.f32.mrb[30].mxu0  ;;  %v1426_v21 = vpop.f32.mrb[30].mxu1 }
 0x11c   :  { %v1087_v22 = vadd.f32 %v1640_v38, %v1016_v14  ;;  %v1119_v23 = vadd.f32 %v1640_v38, %v1048_v15  ;;  %v1017_v24 = vmul.f32 %v1394_v20, %v1635_v36  ;;  %v1049_v25 = vmul.f32 %v1426_v21, %v1635_v36  ;;  %v644_v26 = vpop.f32.mrb[31].mxu0  ;;  %v772_v27 = vpop.f32.mrb[31].mxu1 }
 0x11d   :  { %v1085_v28 = vadd.f32 %v1640_v38, %v1014_v18  ;;  %v1117_v29 = vadd.f32 %v1640_v38, %v1046_v19  ;;  %v1015_v30 = vmul.f32 %v1635_v36, %v644_v26  ;;  %v1047_v31 = vmul.f32 %v1635_v36, %v772_v27 }
 0x11e   :  { %v1151_v32 = vmax.f32 %v1087_v22, 0.0  ;;  %v1183_v33 = vmax.f32 %v1119_v23, 0.0  ;;  %v1088_v34 = vadd.f32 %v1640_v38, %v1017_v24  ;;  %v1120_v35 = vadd.f32 %v1640_v38, %v1049_v25 }
 0x11f   :  { %v1149_v37 = vmax.f32 %v1085_v28, 0.0  ;;  %v1181_v39 = vmax.f32 %v1117_v29, 0.0  ;;  %v1086_v40 = vadd.f32 %v1640_v38, %v1015_v30  ;;  %v1118_v41 = vadd.f32 %v1640_v38, %v1047_v31 }
 0x120   :  { %1215 = vst [vmem:[%s1966_s4 + $0xf0] sm:$0xff] %v1151_v32  ;;  %1247 = vst [vmem:[%s1966_s4 + $0x1f0] sm:$0xff] %v1183_v33  ;;  %v1152_v36 = vmax.f32 %v1088_v34, 0.0  ;;  %v1184_v42 = vmax.f32 %v1120_v35, 0.0 }
 0x121   :  { %1213 = vst [vmem:[%s1966_s4 + $0xe0] sm:$0xff] %v1149_v37  ;;  %1245 = vst [vmem:[%s1966_s4 + $0x1e0] sm:$0xff] %v1181_v39  ;;  %v1150_v43 = vmax.f32 %v1086_v40, 0.0  ;;  %v1182_v38 = vmax.f32 %v1118_v41, 0.0 }
 0x122   :  { %1216 = vst [vmem:[%s1966_s4 + $0xf8] sm:$0xff] %v1152_v36  ;;  %1248 = vst [vmem:[%s1966_s4 + $0x1f8] sm:$0xff] %v1184_v42 }
 0x123   :  { %1214 = vst [vmem:[%s1966_s4 + $0xe8] sm:$0xff] %v1150_v43  ;;  %1246 = vst [vmem:[%s1966_s4 + $0x1e8] sm:$0xff] %v1182_v38 }

</bundles_post_ra>
